<compile_context>
chip_gen: v5e
topology: v5e:2x2
jax: 0.10.0
libtpu: 0.0.40
codegen_flags: <defaults>
</compile_context>

<pallas_src>
import math
from functools import partial

import jax
import jax.numpy as jnp
from jax import lax
from jax.experimental import pallas as pl
from jax.experimental.pallas import tpu as pltpu

EPS = 1e-07
S = 64.0
M = 0.5


def _round_up(x, n):
    return (x + n - 1) // n * n


def arcface_kernel(x_ref, w_ref, labels_ref, out_ref, l_ref,
                   inv_norm_ref, cos_t_ref, sumexp_ref,
                   *, s, cos_m, sin_m, eps, n_pad, tc):
    j = pl.program_id(1)
    nj = pl.num_programs(1)

    x = x_ref[...]                      # (tb, D) f32, resident across the j loop
    w = w_ref[...]                      # (tc, D) f32 tile of the PyTorch-layout weight

    # logits on the raw (unnormalized) x: contract over D of both operands
    # (A @ B^T) -> no host-side transpose of the (C, D) weight matrix.
    logits = lax.dot_general(
        x, w, dimension_numbers=(((1,), (1,)), ((), ())),
        preferred_element_type=jnp.float32)                      # (tb, tc)
    out_ref[...] = logits

    @pl.when(j == 0)
    def _init():
        nrm = jnp.sqrt(jnp.sum(x * x, axis=1, keepdims=True))    # (tb, 1)
        # Exact reciprocal on purpose: exp(s*cos) with s=64 amplifies relative
        # error ~64x, so the ~2^-12 error of pl.reciprocal(approx=True) is not
        # safe on this path (and this is a tiny (tb,1) op once per batch tile).
        inv_norm_ref[...] = 1.0 / jnp.maximum(nrm, 1e-12)
        cos_t_ref[...] = jnp.zeros_like(cos_t_ref)
        sumexp_ref[...] = jnp.zeros_like(sumexp_ref)

    # normalize(x) @ W^T == (x @ W^T) / ||x||  -> reuse the single matmul.
    cosines = logits * inv_norm_ref[...]                         # (tb, tc)

    # one-hot of the label inside this class tile (global column = j*tc + col).
    col = lax.broadcasted_iota(jnp.int32, cosines.shape, 1) + j * tc
    onehot = col == labels_ref[...]                              # (tb, tc)

    # Running full sum of exp(s*cos) over all (real + padded) classes; padded
    # classes have zero weight rows -> cos = 0 -> exp = 1 each, corrected at
    # finalize.  Running cos at the label column (non-label columns add 0).
    sumexp_ref[...] += jnp.sum(jnp.exp(s * cosines), axis=1, keepdims=True)
    cos_t_ref[...] += jnp.sum(jnp.where(onehot, cosines, 0.0), axis=1,
                              keepdims=True)

    @pl.when(j == nj - 1)
    def _finalize():
        cos_t = cos_t_ref[...]                                   # (tb, 1)
        t = jnp.clip(cos_t, -1.0 + eps, 1.0 - eps)
        # s * cos(arccos(t) + m)
        numerator = s * (t * cos_m - jnp.sqrt(1.0 - t * t) * sin_m)
        # sum over non-label real classes = full_sum - n_pad - exp(s*cos_t)
        # (clamped at 0 to guard float cancellation when the label dominates).
        rest = jnp.maximum(
            sumexp_ref[...] - float(n_pad) - jnp.exp(s * cos_t), 0.0)
        # NOTE: intentionally NO max-subtraction log-sum-exp, to match the
        # reference's overflow behavior bit-for-bit in spirit.
        denom = jnp.exp(numerator) + rest
        l_ref[...] = numerator - jnp.log(denom)


def arcface_forward(x, weight, labels, *, s=S, m=M, eps=EPS,
                    block_b=128, block_c=512):
    """x: (B, D) f32, weight: (C, D) f32 (PyTorch nn.Linear layout), labels: (B,) int.

    Returns (loss_scalar, output) matching the PyTorch module's (-mean(L), fc(x)).
    """
    x = jnp.asarray(x, jnp.float32)
    weight = jnp.asarray(weight, jnp.float32)
    labels = jnp.asarray(labels, jnp.int32)
    B, D = x.shape
    C = weight.shape[0]

    # Tile sizes: sublane-aligned batch tile, lane-dense 128/256-aligned class tile
    # (512 is a multiple of 256 for v6e/v7x MXU and of 128 for v5e).
    tb = min(block_b, _round_up(B, 8))
    tc = min(block_c, _round_up(C, 128))
    B_pad = _round_up(B, tb)
    C_pad = _round_up(C, tc)

    x_p = jnp.pad(x, ((0, B_pad - B), (0, 0)))
    w_p = jnp.pad(weight, ((0, C_pad - C), (0, 0)))      # zero rows for padded classes
    lab_p = jnp.pad(labels, (0, B_pad - B)).reshape(B_pad, 1)

    grid = (B_pad // tb, C_pad // tc)

    kernel = partial(
        arcface_kernel,
        s=float(s), cos_m=float(math.cos(m)), sin_m=float(math.sin(m)),
        eps=float(eps), n_pad=int(C_pad - C), tc=int(tc))

    # Rough per-step VMEM footprint (double-buffered blocks + scratch); keep the
    # scoped limit within v7x's 64 MiB physical VMEM.
    est = 4 * (2 * tb * D + 2 * tc * D + 2 * tb * tc + 4 * tb + 3 * tb)
    vmem_limit = int(min(max(2 * est + (4 << 20), 32 << 20), 60 << 20))

    out_p, l_p = pl.pallas_call(
        kernel,
        grid=grid,
        out_shape=(
            jax.ShapeDtypeStruct((B_pad, C_pad), jnp.float32),   # logits fc(x)
            jax.ShapeDtypeStruct((B_pad, 1), jnp.float32),       # per-row L
        ),
        in_specs=[
            pl.BlockSpec((tb, D), lambda i, j: (i, 0)),          # x (resident over j)
            pl.BlockSpec((tc, D), lambda i, j: (j, 0)),          # W tile, streamed
            pl.BlockSpec((tb, 1), lambda i, j: (i, 0)),          # labels
            # TODO(synk): labels could be scalar-prefetched into SMEM instead of a
            # (tb,1) VMEM block; kept in VMEM for the vector one-hot compare.
        ],
        out_specs=(
            pl.BlockSpec((tb, tc), lambda i, j: (i, j)),         # lane-dense logits tile
            pl.BlockSpec((tb, 1), lambda i, j: (i, 0)),          # L (written at last j)
        ),
        scratch_shapes=[
            pltpu.VMEM((tb, 1), jnp.float32),    # 1 / ||x||
            pltpu.VMEM((tb, 1), jnp.float32),    # running cos_t
            pltpu.VMEM((tb, 1), jnp.float32),    # running sum exp(s*cos)
        ],
        compiler_params=pltpu.CompilerParams(
            dimension_semantics=("parallel", "arbitrary"),
            vmem_limit_bytes=vmem_limit,
        ),
    )(x_p, w_p, lab_p)

    output = out_p[:B, :C]
    loss = -jnp.mean(l_p[:B, 0])
    return loss, output


def arcface_ref(x, weight, labels, s=S, m=M, eps=EPS):
    """Pure-JAX reference of the PyTorch forward (sanity check)."""
    output = x @ weight.T
    xn = x / jnp.maximum(jnp.linalg.norm(x, axis=1, keepdims=True), 1e-12)
    cos = xn @ weight.T
    ct = cos[jnp.arange(x.shape[0]), labels]
    t = jnp.clip(ct, -1.0 + eps, 1.0 - eps)
    num = s * jnp.cos(jnp.arccos(t) + m)
    onehot = jax.nn.one_hot(labels, weight.shape[0], dtype=bool)
    rest_sum = jnp.sum(jnp.where(onehot, 0.0, jnp.exp(s * cos)), axis=1)
    denom = jnp.exp(num) + rest_sum
    L = num - jnp.log(denom)
    return -jnp.mean(L), output


if __name__ == "__main__":
    key = jax.random.PRNGKey(0)
    k1, k2, k3 = jax.random.split(key, 3)

    B, in_features, out_features = 8, 32, 16

    x = jax.random.normal(k1, (B, in_features), dtype=jnp.float32)
    # deterministic nn.Linear-style init: U(-1/sqrt(in), 1/sqrt(in))
    bound = 1.0 / (in_features ** 0.5)
    weight = jax.random.uniform(
        k2, (out_features, in_features), minval=-bound, maxval=bound,
        dtype=jnp.float32)
    labels = jax.random.randint(k3, (B,), 0, out_features, dtype=jnp.int32)

    loss, out = arcface_forward(x, weight, labels)
    jax.block_until_ready((loss, out))

    ref_loss, ref_out = arcface_ref(x, weight, labels)
    assert jnp.allclose(out, ref_out, rtol=1e-4, atol=1e-4), "output mismatch"
    assert jnp.allclose(loss, ref_loss, rtol=1e-4, atol=1e-4), "loss mismatch"

    print("KERNEL_OK")
</pallas_src>

<mosaic_0001>
module attributes {stable_mosaic.version = 11 : i64} {
  func.func @arcface_kernel(%arg0: i32, %arg1: i32, %arg2: memref<8x32xf32, #tpu.memory_space<vmem>>, %arg3: memref<128x32xf32, #tpu.memory_space<vmem>>, %arg4: memref<8x1xi32, #tpu.memory_space<vmem>>, %arg5: memref<8x128xf32, #tpu.memory_space<vmem>>, %arg6: memref<8x1xf32, #tpu.memory_space<vmem>>, %arg7: memref<8x1xf32, #tpu.memory_space<vmem>>, %arg8: memref<8x1xf32, #tpu.memory_space<vmem>>, %arg9: memref<8x1xf32, #tpu.memory_space<vmem>>) attributes {dimension_semantics = [#tpu.dimension_semantics<parallel>, #tpu.dimension_semantics<arbitrary>], iteration_bounds = array<i64: 1, 1>, scalar_prefetch = 0 : i64, scratch_operands = 3 : i64, tpu.core_type = #tpu.core_type<tc>, window_params = [{transform_indices = @transform_0, window_bounds = array<i64: 8, 32>}, {transform_indices = @transform_1, window_bounds = array<i64: 128, 32>}, {transform_indices = @transform_2, window_bounds = array<i64: 8, 1>}, {transform_indices = @transform_3, window_bounds = array<i64: 8, 128>}, {transform_indices = @transform_4, window_bounds = array<i64: 8, 1>}]} {
    %c0 = arith.constant 0 : index
    %c0_0 = arith.constant 0 : index
    %0 = vector.load %arg2[%c0, %c0_0] : memref<8x32xf32, #tpu.memory_space<vmem>>, vector<8x32xf32>
    %c0_1 = arith.constant 0 : index
    %c0_2 = arith.constant 0 : index
    %1 = vector.load %arg3[%c0_1, %c0_2] : memref<128x32xf32, #tpu.memory_space<vmem>>, vector<128x32xf32>
    %cst = arith.constant dense<0.000000e+00> : vector<8x128xf32>
    %2 = tpu.matmul %0, %1, %cst {dimension_numbers = #tpu.dot_dimension_numbers<[1], [1], [0], [0], [0, 0, 1, 0], [], []>} : vector<8x32xf32>, vector<128x32xf32>, vector<8x128xf32> -> vector<8x128xf32>
    %c0_3 = arith.constant 0 : index
    %c0_4 = arith.constant 0 : index
    %3 = vector.load %arg5[%c0_3, %c0_4] : memref<8x128xf32, #tpu.memory_space<vmem>>, vector<8x128xf32>
    tpu.vector_store %arg5[%c0_3, %c0_4], %2 {strides = array<i32>} : memref<8x128xf32, #tpu.memory_space<vmem>>, vector<8x128xf32>,
    %c0_i32 = arith.constant 0 : i32
    %4 = arith.cmpi eq, %arg1, %c0_i32 : i32
    %5 = arith.extui %4 : i1 to i32
    %c0_i32_5 = arith.constant 0 : i32
    %6 = arith.cmpi ne, %5, %c0_i32_5 : i32
    scf.if %6 {
      %35 = arith.mulf %0, %0 : vector<8x32xf32>
      %cst_24 = arith.constant dense<0.000000e+00> : vector<8xf32>
      %36 = vector.multi_reduction <add>, %35, %cst_24 [1] : vector<8x32xf32> to vector<8xf32>
      %37 = vector.shape_cast %36 : vector<8xf32> to vector<8x1xf32>
      %38 = math.sqrt %37 : vector<8x1xf32>
      %cst_25 = arith.constant 9.99999996E-13 : f32
      %39 = vector.broadcast %cst_25 : f32 to vector<8x1xf32>
      %40 = arith.maximumf %38, %39 : vector<8x1xf32>
      %cst_26 = arith.constant 1.000000e+00 : f32
      %41 = vector.broadcast %cst_26 : f32 to vector<8x1xf32>
      %42 = arith.divf %41, %40 : vector<8x1xf32>
      %c0_27 = arith.constant 0 : index
      %c0_28 = arith.constant 0 : index
      %43 = vector.load %arg7[%c0_27, %c0_28] : memref<8x1xf32, #tpu.memory_space<vmem>>, vector<8x1xf32>
      tpu.vector_store %arg7[%c0_27, %c0_28], %42 {strides = array<i32>} : memref<8x1xf32, #tpu.memory_space<vmem>>, vector<8x1xf32>,
      %cst_29 = arith.constant 0.000000e+00 : f32
      %44 = vector.broadcast %cst_29 : f32 to vector<8x1xf32>
      %c0_30 = arith.constant 0 : index
      %c0_31 = arith.constant 0 : index
      %45 = vector.load %arg8[%c0_30, %c0_31] : memref<8x1xf32, #tpu.memory_space<vmem>>, vector<8x1xf32>
      tpu.vector_store %arg8[%c0_30, %c0_31], %44 {strides = array<i32>} : memref<8x1xf32, #tpu.memory_space<vmem>>, vector<8x1xf32>,
      %cst_32 = arith.constant 0.000000e+00 : f32
      %46 = vector.broadcast %cst_32 : f32 to vector<8x1xf32>
      %c0_33 = arith.constant 0 : index
      %c0_34 = arith.constant 0 : index
      %47 = vector.load %arg9[%c0_33, %c0_34] : memref<8x1xf32, #tpu.memory_space<vmem>>, vector<8x1xf32>
      tpu.vector_store %arg9[%c0_33, %c0_34], %46 {strides = array<i32>} : memref<8x1xf32, #tpu.memory_space<vmem>>, vector<8x1xf32>,
    } else {
    }
    %c0_6 = arith.constant 0 : index
    %c0_7 = arith.constant 0 : index
    %7 = vector.load %arg7[%c0_6, %c0_7] : memref<8x1xf32, #tpu.memory_space<vmem>>, vector<8x1xf32>
    %8 = vector.broadcast %7 : vector<8x1xf32> to vector<8x128xf32>
    %9 = arith.mulf %2, %8 : vector<8x128xf32>
    %10 = tpu.iota {dimensions = array<i32: 1>} : vector<8x128xi32>
    %c128_i32 = arith.constant 128 : i32
    %11 = arith.muli %arg1, %c128_i32 : i32
    %12 = vector.broadcast %11 : i32 to vector<8x128xi32>
    %13 = arith.addi %10, %12 : vector<8x128xi32>
    %c0_8 = arith.constant 0 : index
    %c0_9 = arith.constant 0 : index
    %14 = vector.load %arg4[%c0_8, %c0_9] : memref<8x1xi32, #tpu.memory_space<vmem>>, vector<8x1xi32>
    %15 = vector.broadcast %14 : vector<8x1xi32> to vector<8x128xi32>
    %16 = arith.cmpi eq, %13, %15 : vector<8x128xi32>
    %c0_10 = arith.constant 0 : index
    %c0_11 = arith.constant 0 : index
    %17 = vector.load %arg9[%c0_10, %c0_11] : memref<8x1xf32, #tpu.memory_space<vmem>>, vector<8x1xf32>
    %cst_12 = arith.constant 6.400000e+01 : f32
    %18 = vector.broadcast %cst_12 : f32 to vector<8x128xf32>
    %19 = arith.mulf %18, %9 : vector<8x128xf32>
    %20 = math.exp %19 : vector<8x128xf32>
    %cst_13 = arith.constant dense<0.000000e+00> : vector<8xf32>
    %21 = vector.multi_reduction <add>, %20, %cst_13 [1] : vector<8x128xf32> to vector<8xf32>
    %22 = vector.shape_cast %21 : vector<8xf32> to vector<8x1xf32>
    %23 = arith.addf %17, %22 : vector<8x1xf32>
    %c0_14 = arith.constant 0 : index
    %c0_15 = arith.constant 0 : index
    %24 = vector.load %arg9[%c0_14, %c0_15] : memref<8x1xf32, #tpu.memory_space<vmem>>, vector<8x1xf32>
    tpu.vector_store %arg9[%c0_14, %c0_15], %23 {strides = array<i32>} : memref<8x1xf32, #tpu.memory_space<vmem>>, vector<8x1xf32>,
    %c0_16 = arith.constant 0 : index
    %c0_17 = arith.constant 0 : index
    %25 = vector.load %arg8[%c0_16, %c0_17] : memref<8x1xf32, #tpu.memory_space<vmem>>, vector<8x1xf32>
    %cst_18 = arith.constant 0.000000e+00 : f32
    %26 = vector.broadcast %cst_18 : f32 to vector<8x128xf32>
    %27 = arith.select %16, %9, %26 : vector<8x128xi1>, vector<8x128xf32>
    %cst_19 = arith.constant dense<0.000000e+00> : vector<8xf32>
    %28 = vector.multi_reduction <add>, %27, %cst_19 [1] : vector<8x128xf32> to vector<8xf32>
    %29 = vector.shape_cast %28 : vector<8xf32> to vector<8x1xf32>
    %30 = arith.addf %25, %29 : vector<8x1xf32>
    %c0_20 = arith.constant 0 : index
    %c0_21 = arith.constant 0 : index
    %31 = vector.load %arg8[%c0_20, %c0_21] : memref<8x1xf32, #tpu.memory_space<vmem>>, vector<8x1xf32>
    tpu.vector_store %arg8[%c0_20, %c0_21], %30 {strides = array<i32>} : memref<8x1xf32, #tpu.memory_space<vmem>>, vector<8x1xf32>,
    %c0_i32_22 = arith.constant 0 : i32
    %32 = arith.cmpi eq, %arg1, %c0_i32_22 : i32
    %33 = arith.extui %32 : i1 to i32
    %c0_i32_23 = arith.constant 0 : i32
    %34 = arith.cmpi ne, %33, %c0_i32_23 : i32
    scf.if %34 {
      %c0_24 = arith.constant 0 : index
      %c0_25 = arith.constant 0 : index
      %35 = vector.load %arg8[%c0_24, %c0_25] : memref<8x1xf32, #tpu.memory_space<vmem>>, vector<8x1xf32>
      %cst_26 = arith.constant -0.99999988 : f32
      %cst_27 = arith.constant 0.99999988 : f32
      %36 = vector.broadcast %cst_26 : f32 to vector<8x1xf32>
      %37 = arith.maximumf %36, %35 : vector<8x1xf32>
      %38 = vector.broadcast %cst_27 : f32 to vector<8x1xf32>
      %39 = arith.minimumf %38, %37 : vector<8x1xf32>
      %cst_28 = arith.constant 0.87758255 : f32
      %40 = vector.broadcast %cst_28 : f32 to vector<8x1xf32>
      %41 = arith.mulf %39, %40 : vector<8x1xf32>
      %42 = arith.mulf %39, %39 : vector<8x1xf32>
      %cst_29 = arith.constant 1.000000e+00 : f32
      %43 = vector.broadcast %cst_29 : f32 to vector<8x1xf32>
      %44 = arith.subf %43, %42 : vector<8x1xf32>
      %45 = math.sqrt %44 : vector<8x1xf32>
      %cst_30 = arith.constant 0.47942555 : f32
      %46 = vector.broadcast %cst_30 : f32 to vector<8x1xf32>
      %47 = arith.mulf %45, %46 : vector<8x1xf32>
      %48 = arith.subf %41, %47 : vector<8x1xf32>
      %cst_31 = arith.constant 6.400000e+01 : f32
      %49 = vector.broadcast %cst_31 : f32 to vector<8x1xf32>
      %50 = arith.mulf %49, %48 : vector<8x1xf32>
      %c0_32 = arith.constant 0 : index
      %c0_33 = arith.constant 0 : index
      %51 = vector.load %arg9[%c0_32, %c0_33] : memref<8x1xf32, #tpu.memory_space<vmem>>, vector<8x1xf32>
      %cst_34 = arith.constant 1.120000e+02 : f32
      %52 = vector.broadcast %cst_34 : f32 to vector<8x1xf32>
      %53 = arith.subf %51, %52 : vector<8x1xf32>
      %cst_35 = arith.constant 6.400000e+01 : f32
      %54 = vector.broadcast %cst_35 : f32 to vector<8x1xf32>
      %55 = arith.mulf %54, %35 : vector<8x1xf32>
      %56 = math.exp %55 : vector<8x1xf32>
      %57 = arith.subf %53, %56 : vector<8x1xf32>
      %cst_36 = arith.constant 0.000000e+00 : f32
      %58 = vector.broadcast %cst_36 : f32 to vector<8x1xf32>
      %59 = arith.maximumf %57, %58 : vector<8x1xf32>
      %60 = math.exp %50 : vector<8x1xf32>
      %61 = arith.addf %60, %59 : vector<8x1xf32>
      %62 = math.log %61 : vector<8x1xf32>
      %63 = arith.subf %50, %62 : vector<8x1xf32>
      %c0_37 = arith.constant 0 : index
      %c0_38 = arith.constant 0 : index
      %64 = vector.load %arg6[%c0_37, %c0_38] : memref<8x1xf32, #tpu.memory_space<vmem>>, vector<8x1xf32>
      tpu.vector_store %arg6[%c0_37, %c0_38], %63 {strides = array<i32>} : memref<8x1xf32, #tpu.memory_space<vmem>>, vector<8x1xf32>,
    } else {
    }
    return
  }
  func.func @transform_0(%arg0: i32, %arg1: i32) -> (i32, i32) {
    %c0_i32 = arith.constant 0 : i32
    %c0_i32_0 = arith.constant 0 : i32
    return %arg0, %c0_i32 : i32, i32
  }
  func.func @transform_1(%arg0: i32, %arg1: i32) -> (i32, i32) {
    %c0_i32 = arith.constant 0 : i32
    %c0_i32_0 = arith.constant 0 : i32
    return %arg1, %c0_i32 : i32, i32
  }
  func.func @transform_2(%arg0: i32, %arg1: i32) -> (i32, i32) {
    %c0_i32 = arith.constant 0 : i32
    %c0_i32_0 = arith.constant 0 : i32
    return %arg0, %c0_i32 : i32, i32
  }
  func.func @transform_3(%arg0: i32, %arg1: i32) -> (i32, i32) {
    %c0_i32 = arith.constant 0 : i32
    return %arg0, %arg1 : i32, i32
  }
  func.func @transform_4(%arg0: i32, %arg1: i32) -> (i32, i32) {
    %c0_i32 = arith.constant 0 : i32
    %c0_i32_0 = arith.constant 0 : i32
    return %arg0, %c0_i32 : i32, i32
  }
}

</mosaic_0001>

<bundles_post_ra>
// kernel: tpu_custom_call.1
= control target key start
LH: loop header
LB: loop body
LE: loop exit
PB: predicated region body
PF: predicated region fallthrough
CT: control target
= control target key end

     0   :  { %vm34_vm0 = vcmask 261120   ;;  %s413_s0 = inlined_call_operand.vmem [shape: f32[8,32], index: 0, kind: input, shape index: {}]   ;;  %s414_s1 = inlined_call_operand.vmem [shape: f32[128,32], index: 1, kind: input, shape index: {}]   ;;  %s415_s2 = inlined_call_operand.vmem [shape: s32[8,1], index: 2, kind: input, shape index: {}]   ;;  %s416_s3 = inlined_call_operand.hbm [shape: f32[8,128], index: 3, kind: output, shape index: {0}]   ;;  %s417_s4 = inlined_call_operand.vmem [shape: f32[8,1], index: 4, kind: output, shape index: {1}]  }
   0x1   :  { %v17_v0 = vld [vmem:[%s413_s0] sm:$0xff]  ;;  %v33_v1 = vld [vmem:[%s414_s1 + $0x78] sm:$0xff]  ;;  %v32_v3 = vld [vmem:[%s414_s1 + $0x70] sm:$0xff] }
   0x2   :  { %v111_v2 = vmul.f32 %v17_v0, %v17_v0  ;;  %237 = vmatpush.xpose.msk.msra.mxu0 %vm34_vm0, %v33_v1 }
   0x3   :  { %10 = vsyncpa [#allocation6], 0  ;;  %v31_v5 = vld [vmem:[%s414_s1 + $0x68] sm:$0xff]  ;;  %v30_v6 = vld [vmem:[%s414_s1 + $0x60] sm:$0xff]  ;;  %v301_v22 = vmov 0   ;;  %vm143_vm6 = vcmask 7168   ;;  %v154_v46 = vlaneseq }
   0x4   :  { %v112_v4 = vsel %vm34_vm0, %v111_v2, 0.0  ;;  %v29_v7 = vld [vmem:[%s414_s1 + $0x58] sm:$0xff]  ;;  %v28_v8 = vld [vmem:[%s414_s1 + $0x50] sm:$0xff]  ;;  %v27_v9 = vld [vmem:[%s414_s1 + $0x48] sm:$0xff]  ;;  %259 = vset.pattern.permute.xlu0 %v301_v22  ;;  %260 = vset.pattern.permute.xlu1 %v301_v22  ;;  %v302_v45 = vmov 0.0   ;;  %s224_s25 = sshll.u32 %s416_s3, 4  ;;  %s225_s25 = int_to_ptr.hbm [resolvable:$true] %s224_s25 }
   0x5   :  { %113 = vadd.xlane.f32.xlu0 %v112_v4  ;;  %v26_v10 = vld [vmem:[%s414_s1 + $0x40] sm:$0xff]  ;;  %v25_v11 = vld [vmem:[%s414_s1 + $0x38] sm:$0xff]  ;;  %v24_v12 = vld [vmem:[%s414_s1 + $0x30] sm:$0xff]  ;;  %145 = vst.msk [vmem:[#allocation3] sm:$0xff] %vm143_vm6, %v302_v45  ;;  %v155_v47 = vand.u32 127, %v154_v46 }
   0x6   :  { %238 = vmatpush.xpose.msk.msra.mxu0 %vm34_vm0, %v32_v3  ;;  %v23_v13 = vld [vmem:[%s414_s1 + $0x28] sm:$0xff]  ;;  %v22_v14 = vld [vmem:[%s414_s1 + $0x20] sm:$0xff]  ;;  %v21_v15 = vld [vmem:[%s414_s1 + $0x18] sm:$0xff]  ;;  %146 = vst.msk [vmem:[#allocation4] sm:$0xff] %vm143_vm6, %v302_v45 }
   0x7   :  { %v20_v16 = vld [vmem:[%s414_s1 + $0x10] sm:$0xff]  ;;  %v19_v17 = vld [vmem:[%s414_s1 + $0x8] sm:$0xff]  ;;  %v18_v19 = vld [vmem:[%s414_s1] sm:$0xff]  ;;  %s303_s1 = smov [#allocation5]  }
   0x8   :  { %v159_v27 = vld [vmem:[%s415_s2] sm:$0xff]  ;;  %s222_s2 = sshll.u32 %s303_s1, 4  ;;  %s223_s2 = int_to_ptr.vmem [resolvable:$true] %s222_s2 }
   0x9   :  { %161 = vperm.xlu1 %260, %v159_v27  }
   0xa   :  { %239 = vmatpush.xpose.msk.msra.mxu0 %vm34_vm0, %v31_v5 }
   0xc   :  { %v173_v55 = vld [vmem:[#allocation3] sm:$0xff] }
   0xd   :  { %v164_v58 = vld [vmem:[#allocation4] sm:$0xff] }
   0xe   :  { %240 = vmatpush.xpose.msk.msra.mxu0 %vm34_vm0, %v30_v6 }
  0x12   :  { %241 = vmatpush.xpose.msk.msra.mxu0 %vm34_vm0, %v29_v7 }
  0x16   :  { %242 = vmatpush.xpose.msk.msra.mxu0 %vm34_vm0, %v28_v8 }
  0x1a   :  { %243 = vmatpush.xpose.msk.msra.mxu0 %vm34_vm0, %v27_v9 }
  0x1e   :  { %244 = vmatpush.xpose.msk.msra.mxu0 %vm34_vm0, %v26_v10 }
  0x22   :  { %245 = vmatpush.xpose.msk.msra.mxu0 %vm34_vm0, %v25_v11 }
  0x26   :  { %246 = vmatpush.xpose.msk.msra.mxu0 %vm34_vm0, %v24_v12 }
  0x2a   :  { %247 = vmatpush.xpose.msk.msra.mxu0 %vm34_vm0, %v23_v13 }
  0x2e   :  { %248 = vmatpush.xpose.msk.msra.mxu0 %vm34_vm0, %v22_v14 }
  0x32   :  { %249 = vmatpush.xpose.msk.msra.mxu0 %vm34_vm0, %v21_v15 }
  0x36   :  { %250 = vmatpush.xpose.msk.msra.mxu0 %vm34_vm0, %v20_v16 }
  0x3a   :  { %251 = vmatpush.xpose.msk.msra.mxu0 %vm34_vm0, %v19_v17 }
  0x3e   :  { %252 = vmatpush.xpose.msk.msra.mxu0 %vm34_vm0, %v18_v19 }
  0x41   :  { %253 = vmatmul.msk.f32.vlgmr.msra.gmra.mxu0 %vm34_vm0, %v17_v0 }
  0x78   :  { %v114_v18 = vpop.xlane.xlu0 %113 }
  0x79   :  { %261 = vrsqrt.f32 %v114_v18  ;;  %vm122_vm1 = vcmp.eq.f32.partialorder %v114_v18, inf  ;;  %v125_v29 = vand.u32 2147483648, %v114_v18  ;;  %vm124_vm2 = vcmp.eq.f32.partialorder %v114_v18, 0.0 }
  0x7b   :  { %v162_v48 = vpop.permute.xlu1 %161 }
  0x7c   :  { %vm163_vm8 = vcmp.eq.s32.totalorder %v155_v47, %v162_v48 }
  0x7f   :  { %v262_v20 = vpop.eup %261 }
  0x80   :  { %v116_v21 = vmul.f32 %v262_v20, %v114_v18 }
  0x82   :  { %v117_v23 = vmul.f32 %v262_v20, %v116_v21 }
  0x84   :  { %v118_v24 = vmul.f32 0.5, %v117_v23 }
  0x86   :  { %v119_v25 = vsub.f32 1.5, %v118_v24 }
  0x88   :  { %v120_v26 = vmul.f32 %v262_v20, %v119_v25 }
  0x8a   :  { %v121_v28 = vmul.f32 %v120_v26, %v114_v18 }
  0x8c   :  { %v123_v30 = vsel %vm122_vm1, %v114_v18, %v121_v28 }
  0x8d   :  { %v126_v31 = vsel %vm124_vm2, %v125_v29, %v123_v30 }
  0x8e   :  { %v127_v32 = vmax.f32 %v126_v31, 1e-12 }
  0x90   :  { %263 = vrcp.f32 %v127_v32  ;;  %v139_v36 = vand.u32 2147483648, %v127_v32  ;;  %v137_v38 = vand.u32 2147483647, %v127_v32  ;;  %vm133_vm4 = vweird.f32 %v127_v32 }
  0x92   :  { %v140_v40 = vor.u32 1.1754944e-38, %v139_v36  ;;  %vm138_vm7 = vcmp.eq.f32.partialorder %v137_v38, 8.507059e+37 }
  0x96   :  { %v264_v33 = vpop.eup %263 }
  0x97   :  { %v129_v34 = vmul.f32 %v264_v33, %v127_v32  ;;  %vm134_vm3 = vweird.f32 %v264_v33 }
  0x98   :  { %vm135_vm5 = vmor %vm133_vm4, %vm134_vm3 }
  0x99   :  { %v130_v35 = vsub.f32 1.0, %v129_v34 }
  0x9b   :  { %v131_v37 = vmul.f32 %v264_v33, %v130_v35 }
  0x9d   :  { %v132_v39 = vadd.f32 %v264_v33, %v131_v37 }
  0x9f   :  { %v136_v41 = vsel %vm135_vm5, %v264_v33, %v132_v39 }
  0xa0   :  { %v141_v42 = vsel %vm138_vm7, %v140_v40, %v136_v41 }
  0xa1   :  { %144 = vst.msk [vmem:[#allocation2] sm:$0xff] %vm143_vm6, %v141_v42 }
  0xa8   :  { %v147_v43 = vld [vmem:[#allocation2] sm:$0xff] }
  0xa9   :  { %150 = vperm.xlu0 %259, %v147_v43  }
  0xbe   :  { %v103_v44 = vpop.f32.mrf.mxu0 }
  0xbf   :  { %106 = vst [vmem:[#allocation5] sm:$0xff] %v103_v44 }
  0xc0   :  { %227 = dma.vmem_to_hbm [thread:$0]  %s223_s2, 128, %s225_s25, [#allocation6]  }
 0x11b   :  { %v151_v49 = vpop.permute.xlu0 %150 }
 0x11c   :  { %v153_v50 = vmul.f32 %v151_v49, %v103_v44 }
 0x11e   :  { %v174_v51 = vsel %vm163_vm8, %v153_v50, 0.0  ;;  %v165_v52 = vmul.f32 64.0, %v153_v50 }
 0x11f   :  { %175 = vadd.xlane.f32.xlu1 %v174_v51 }
 0x120   :  { %v166_v53 = vmul.f32 1.442695, %v165_v52 }
 0x122   :  { %265 = vpow2.f32 %v166_v53 }
 0x128   :  { %v266_v54 = vpop.eup %265 }
 0x129   :  { %168 = vadd.xlane.f32.xlu2 %v266_v54 }
 0x192   :  { %v176_v56 = vpop.xlane.xlu1 %175 }
 0x193   :  { %v177_v57 = vadd.f32 %v176_v56, %v173_v55 }
 0x195   :  { %178 = vst.msk [vmem:[#allocation3] sm:$0xff] %vm143_vm6, %v177_v57 }
 0x19c   :  { %v182_v59 = vld [vmem:[#allocation3] sm:$0xff]  ;;  %v169_v60 = vpop.xlane.xlu2 %168 }
 0x19d   :  { %v254_v61 = vclamps-f32 %v182_v59, 0.9999999  ;;  %v170_v62 = vadd.f32 %v169_v60, %v164_v58  ;;  %v205_v6 = vmul.f32 64.0, %v182_v59 }
 0x19f   :  { %v186_v63 = vmul.f32 %v254_v61, %v254_v61  ;;  %172 = vst.msk [vmem:[#allocation4] sm:$0xff] %vm143_vm6, %v170_v62  ;;  %v206_v9 = vmul.f32 1.442695, %v205_v6  ;;  %v185_v13 = vmul.f32 0.87758255, %v254_v61 }
 0x1a1   :  { %v187_v0 = vsub.f32 1.0, %v186_v63 }
 0x1a3   :  { %267 = vrsqrt.f32 %v187_v0  ;;  %vm195_vm9 = vcmp.eq.f32.partialorder %v187_v0, inf  ;;  %v198_v10 = vand.u32 2147483648, %v187_v0  ;;  %vm197_vm10 = vcmp.eq.f32.partialorder %v187_v0, 0.0 }
 0x1a4   :  { %269 = vpow2.f32 %v206_v9 }
 0x1a6   :  { %v203_v16 = vld [vmem:[#allocation4] sm:$0xff] }
 0x1a7   :  { %v255_v18 = vadd.f32 -112.0, %v203_v16 }
 0x1a9   :  { %v268_v1 = vpop.eup %267 }
 0x1aa   :  { %v189_v2 = vmul.f32 %v268_v1, %v187_v0  ;;  %v270_v19 = vpop.eup %269 }
 0x1ab   :  { %v208_v21 = vsub.f32 %v255_v18, %v270_v19 }
 0x1ac   :  { %v190_v3 = vmul.f32 %v268_v1, %v189_v2 }
 0x1ad   :  { %v209_v22 = vmax.f32 %v208_v21, 0.0 }
 0x1ae   :  { %v191_v4 = vmul.f32 0.5, %v190_v3 }
 0x1b0   :  { %v192_v5 = vsub.f32 1.5, %v191_v4 }
 0x1b2   :  { %v193_v7 = vmul.f32 %v268_v1, %v192_v5 }
 0x1b4   :  { %v194_v8 = vmul.f32 %v193_v7, %v187_v0 }
 0x1b6   :  { %v196_v11 = vsel %vm195_vm9, %v187_v0, %v194_v8 }
 0x1b7   :  { %v199_v12 = vsel %vm197_vm10, %v198_v10, %v196_v11 }
 0x1b8   :  { %v200_v14 = vmul.f32 0.47942555, %v199_v12 }
 0x1ba   :  { %v201_v15 = vsub.f32 %v185_v13, %v200_v14 }
 0x1bc   :  { %v202_v17 = vmul.f32 64.0, %v201_v15 }
 0x1be   :  { %v210_v20 = vmul.f32 1.442695, %v202_v17 }
 0x1c0   :  { %271 = vpow2.f32 %v210_v20 }
 0x1c6   :  { %v272_v23 = vpop.eup %271 }
 0x1c7   :  { %v212_v24 = vadd.f32 %v272_v23, %v209_v22 }
 0x1c9   :  { %273 = vlog2.f32 %v212_v24 }
 0x1cf   :  { %v274_v25 = vpop.eup %273 }
 0x1d0   :  { %v214_v26 = vmul.f32 0.6931472, %v274_v25 }
 0x1d2   :  { %v215_v27 = vsub.f32 %v202_v17, %v214_v26 }
 0x1d4   :  { %216 = vst.msk [vmem:[%s417_s4] sm:$0xff] %vm143_vm6, %v215_v27 }
 0x1d5   :  { %299 = dma.done.wait [#allocation6], 128  }
 0x1d6   :  { %300 = vsyncadd [#allocation6], 4294967168 }
 0x1d7   :  { %236 = vsyncpa [#allocation6], 1 }

</bundles_post_ra>
